<compile_context>
chip_gen: v7x
topology: tpu7x:2x2x1
jax: 0.10.0
libtpu: 0.0.40
codegen_flags: <defaults>
</compile_context>

<pallas_src>
import jax
import jax.numpy as jnp
from jax.experimental import pallas as pl
from jax.experimental.pallas import tpu as pltpu

LN_EPS = 1e-5
LANE = 128
MAX_BATCH_TILE = 1024


def _round_up(n, m):
    return ((n + m - 1) // m) * m


def _pad2(a, rows, cols, dtype):
    a = jnp.asarray(a, dtype)
    return jnp.zeros((rows, cols), dtype).at[: a.shape[0], : a.shape[1]].set(a)


def _pick_batch_tile(b_padded):
    """b_padded is the (multiple-of-8) padded batch size."""
    tile = min(MAX_BATCH_TILE, b_padded)
    # v7x: keep >=2 grid steps so ("parallel",) splits batch tiles across both
    # TensorCores; no-op for single-TC v5e/v6e, tiny batches stay single-step.
    if b_padded > 8 and pl.cdiv(b_padded, tile) < 2:
        tile = _round_up(pl.cdiv(b_padded, 2), 8)
    return tile


def _behavior_cost_kernel(
    x_ref,    # [TB, F]    f32   flattened input tile (F = time*joint, unpadded)
    a_ref,    # [F, F]     f32   block-diagonal averaging matrix (1/J blocks)
    w1_ref,   # [F, H1p]   bf16  gamma already folded into rows
    b1_ref,   # [1, H1p]   f32   beta@w1 already folded in
    w2_ref,   # [H1p, H2p] bf16
    b2_ref,   # [1, H2p]   f32
    w3_ref,   # [H2p, H3p] bf16
    b3_ref,   # [1, H3p]   f32
    w4_ref,   # [1, H3p]   f32   single output column of the last Linear, as a row
    b4_ref,   # [1, 1]     f32
    o_ref,    # [TB, 1]    f32
):
    x = x_ref[...]                                            # f32 [TB, F]
    tb = x.shape[0]

    # ---- Group LayerNorm: one stacked f32 MXU pass gives mean and E[x^2] ----
    stacked = jnp.concatenate([x, x * x], axis=0)             # [2*TB, F] (sublane-aligned)
    mom = jnp.dot(stacked, a_ref[...], preferred_element_type=jnp.float32)
    mean = mom[:tb]
    ex2 = mom[tb:]
    var = jnp.maximum(ex2 - mean * mean, 0.0)
    z = (x - mean) * jax.lax.rsqrt(var + LN_EPS)              # gamma/beta folded into w1/b1

    # ---- MLP: bf16 operands, f32 accumulation; bias add + ReLU in f32 ----
    def layer(h, w_ref, b_ref):
        return jnp.dot(h.astype(jnp.bfloat16), w_ref[...],
                       preferred_element_type=jnp.float32) + b_ref[...]

    h = jnp.maximum(layer(z, w1_ref, b1_ref), 0.0)
    h = jnp.maximum(layer(h, w2_ref, b2_ref), 0.0)
    h = jnp.maximum(layer(h, w3_ref, b3_ref), 0.0)

    # ---- Output Linear(1): VPU broadcast-multiply + XLU lane reduce (no MXU) ----
    o_ref[...] = jnp.sum(h * w4_ref[...], axis=-1, keepdims=True) + b4_ref[...]


def init_params(key, time, joint=5, hidden1=200, hidden2=50, hidden3=16):
    """Raw (unpadded) params mirroring torch defaults; weights stored [in, out]."""
    def linear(key, fan_in, fan_out):
        kw, kb = jax.random.split(key)
        bound = 1.0 / jnp.sqrt(fan_in)
        w = jax.random.uniform(kw, (fan_in, fan_out), jnp.float32, -bound, bound)
        b = jax.random.uniform(kb, (1, fan_out), jnp.float32, -bound, bound)
        return w, b

    k1, k2, k3, k4 = jax.random.split(key, 4)
    w1, b1 = linear(k1, time * joint, hidden1)
    w2, b2 = linear(k2, hidden1, hidden2)
    w3, b3 = linear(k3, hidden2, hidden3)
    w4, b4 = linear(k4, hidden3, 1)
    return {
        "ln_gamma": jnp.ones((1, 1, joint), jnp.float32),
        "ln_beta": jnp.zeros((1, 1, joint), jnp.float32),
        "w1": w1, "b1": b1, "w2": w2, "b2": b2,
        "w3": w3, "b3": b3, "w4": w4, "b4": b4,
    }


def prepare_kernel_params(params, time, joint):
    """One-time preprocessing (NOT per call):
       - build the block-diagonal averaging matrix A (mean = x @ A), kept at F rows,
       - fold LN gamma into w1's rows and beta@w1 into b1,
       - pad hidden (lane) dims to 128 multiples (free on the MXU),
       - cast matmul weights to bf16; biases / A / w4-row stay f32."""
    F = time * joint
    H1, H2, H3 = params["w1"].shape[1], params["w2"].shape[1], params["w3"].shape[1]
    H1p, H2p, H3p = _round_up(H1, LANE), _round_up(H2, LANE), _round_up(H3, LANE)

    avg = jnp.kron(jnp.eye(time, dtype=jnp.float32),
                   jnp.full((joint, joint), 1.0 / joint, jnp.float32))      # [F, F]

    gamma = jnp.tile(params["ln_gamma"].reshape(joint), time)               # [F]
    beta = jnp.tile(params["ln_beta"].reshape(joint), time)                 # [F]

    w1 = params["w1"].astype(jnp.float32)
    w1_eff = gamma[:, None] * w1                                            # fold gamma
    b1_eff = params["b1"].astype(jnp.float32) + beta[None, :] @ w1          # fold beta

    w4_row = params["w4"].astype(jnp.float32).reshape(1, -1)                # [1, H3]

    return {
        "a": avg,                                                           # [F, F] f32
        "w1": _pad2(w1_eff, F, H1p, jnp.bfloat16),
        "b1": _pad2(b1_eff, 1, H1p, jnp.float32),
        "w2": _pad2(params["w2"], H1p, H2p, jnp.bfloat16),
        "b2": _pad2(params["b2"], 1, H2p, jnp.float32),
        "w3": _pad2(params["w3"], H2p, H3p, jnp.bfloat16),
        "b3": _pad2(params["b3"], 1, H3p, jnp.float32),
        "w4": _pad2(w4_row, 1, H3p, jnp.float32),
        "b4": jnp.asarray(params["b4"], jnp.float32).reshape(1, 1),
    }


def behavior_cost_forward(x, kp):
    """x: [B, T, J] float32 -> y: [B, 1] float32 (kp from prepare_kernel_params)."""
    B, T, J = x.shape
    F = T * J
    assert kp["a"].shape == (F, F)

    # Flatten (no-copy reshape); pad batch only to a multiple of 8 (<= 7 rows).
    x2 = x.reshape(B, F).astype(jnp.float32)
    B8 = _round_up(B, 8)
    if B8 != B:
        x2 = jnp.pad(x2, ((0, B8 - B), (0, 0)))

    tile_b = _pick_batch_tile(B8)
    grid = (pl.cdiv(B8, tile_b),)

    weights = (kp["a"], kp["w1"], kp["b1"], kp["w2"], kp["b2"],
               kp["w3"], kp["b3"], kp["w4"], kp["b4"])
    const2 = lambda i: (0, 0)   # constant index_map -> weights stay VMEM-resident

    y = pl.pallas_call(
        _behavior_cost_kernel,
        out_shape=jax.ShapeDtypeStruct((B8, 1), jnp.float32),
        grid=grid,
        in_specs=[pl.BlockSpec((tile_b, F), lambda i: (i, 0))]
                 + [pl.BlockSpec(w.shape, const2) for w in weights],
        out_specs=pl.BlockSpec((tile_b, 1), lambda i: (i, 0)),
        compiler_params=pltpu.CompilerParams(
            dimension_semantics=("parallel",)),
    )(x2, *weights)

    return y[:B]


def _reference_forward(x, p, mxu_bf16=True):
    """Pure-JAX reference. mxu_bf16=True mirrors the kernel's precision choices
    (bf16 operands for the three hidden layers, f32 last layer); False is the
    exact f32 torch semantics."""
    mean = jnp.mean(x, axis=-1, keepdims=True)
    var = jnp.mean((x - mean) ** 2, axis=-1, keepdims=True)
    xn = (x - mean) * jax.lax.rsqrt(var + LN_EPS) * p["ln_gamma"] + p["ln_beta"]
    h = xn.reshape(x.shape[0], -1)

    def mm(a, w):
        if mxu_bf16:
            return jnp.dot(a.astype(jnp.bfloat16), w.astype(jnp.bfloat16),
                           preferred_element_type=jnp.float32)
        return jnp.dot(a, w)

    h = jnp.maximum(mm(h, p["w1"]) + p["b1"], 0.0)
    h = jnp.maximum(mm(h, p["w2"]) + p["b2"], 0.0)
    h = jnp.maximum(mm(h, p["w3"]) + p["b3"], 0.0)
    return jnp.dot(h, p["w4"]) + p["b4"]   # last layer kept f32 (matches kernel)


if __name__ == "__main__":
    key = jax.random.PRNGKey(0)
    kx, kparam = jax.random.split(key)

    batch, time, joint = 2, 8, 5          # x: (batch, time, joint)
    x = jax.random.normal(kx, (batch, time, joint), jnp.float32)
    raw_params = init_params(kparam, time=time, joint=joint)
    kernel_params = prepare_kernel_params(raw_params, time=time, joint=joint)

    y = jax.block_until_ready(behavior_cost_forward(x, kernel_params))
    assert y.shape == (batch, 1)

    # Check vs. a reference matching the kernel's MXU precision choices.
    y_matched = _reference_forward(x, raw_params, mxu_bf16=True)
    assert jnp.allclose(y, y_matched, atol=1e-2, rtol=1e-2), (y, y_matched)
    # Loose check vs. the exact f32 torch semantics (bf16 operand error only).
    y_exact = _reference_forward(x, raw_params, mxu_bf16=False)
    assert jnp.allclose(y, y_exact, atol=5e-2, rtol=5e-2), (y, y_exact)

    print("KERNEL_OK")
</pallas_src>

<mosaic_0001>
module attributes {stable_mosaic.version = 11 : i64} {
  func.func @_behavior_cost_kernel(%arg0: i32, %arg1: memref<8x40xf32, #tpu.memory_space<vmem>>, %arg2: memref<40x40xf32, #tpu.memory_space<vmem>>, %arg3: memref<40x256xbf16, #tpu.memory_space<vmem>>, %arg4: memref<1x256xf32, #tpu.memory_space<vmem>>, %arg5: memref<256x128xbf16, #tpu.memory_space<vmem>>, %arg6: memref<1x128xf32, #tpu.memory_space<vmem>>, %arg7: memref<128x128xbf16, #tpu.memory_space<vmem>>, %arg8: memref<1x128xf32, #tpu.memory_space<vmem>>, %arg9: memref<1x128xf32, #tpu.memory_space<vmem>>, %arg10: memref<1x1xf32, #tpu.memory_space<vmem>>, %arg11: memref<8x1xf32, #tpu.memory_space<vmem>>) attributes {dimension_semantics = [#tpu.dimension_semantics<parallel>], iteration_bounds = array<i64: 1>, scalar_prefetch = 0 : i64, scratch_operands = 0 : i64, tpu.core_type = #tpu.core_type<tc>, window_params = [{transform_indices = @transform_0, window_bounds = array<i64: 8, 40>}, {pipeline_mode = #tpu.pipeline_mode<synchronous>, transform_indices = @transform_1, window_bounds = array<i64: 40, 40>}, {pipeline_mode = #tpu.pipeline_mode<synchronous>, transform_indices = @transform_2, window_bounds = array<i64: 40, 256>}, {pipeline_mode = #tpu.pipeline_mode<synchronous>, transform_indices = @transform_3, window_bounds = array<i64: 1, 256>}, {pipeline_mode = #tpu.pipeline_mode<synchronous>, transform_indices = @transform_4, window_bounds = array<i64: 256, 128>}, {pipeline_mode = #tpu.pipeline_mode<synchronous>, transform_indices = @transform_5, window_bounds = array<i64: 1, 128>}, {pipeline_mode = #tpu.pipeline_mode<synchronous>, transform_indices = @transform_6, window_bounds = array<i64: 128, 128>}, {pipeline_mode = #tpu.pipeline_mode<synchronous>, transform_indices = @transform_7, window_bounds = array<i64: 1, 128>}, {pipeline_mode = #tpu.pipeline_mode<synchronous>, transform_indices = @transform_8, window_bounds = array<i64: 1, 128>}, {pipeline_mode = #tpu.pipeline_mode<synchronous>, transform_indices = @transform_9, window_bounds = array<i64: 1, 1>}, {transform_indices = @transform_10, window_bounds = array<i64: 8, 1>}]} {
    %c0 = arith.constant 0 : index
    %c0_0 = arith.constant 0 : index
    %0 = vector.load %arg1[%c0, %c0_0] : memref<8x40xf32, #tpu.memory_space<vmem>>, vector<8x40xf32>
    %1 = arith.mulf %0, %0 : vector<8x40xf32>
    %2 = tpu.concatenate %0, %1 in 0 : vector<8x40xf32>, vector<8x40xf32> -> vector<16x40xf32>
    %c0_1 = arith.constant 0 : index
    %c0_2 = arith.constant 0 : index
    %3 = vector.load %arg2[%c0_1, %c0_2] : memref<40x40xf32, #tpu.memory_space<vmem>>, vector<40x40xf32>
    %cst = arith.constant dense<0.000000e+00> : vector<16x40xf32>
    %4 = tpu.matmul %2, %3, %cst {dimension_numbers = #tpu.dot_dimension_numbers<[1], [0], [0], [1], [0, 0, 1, 1], [], []>} : vector<16x40xf32>, vector<40x40xf32>, vector<16x40xf32> -> vector<16x40xf32>
    %5 = vector.extract_strided_slice %4 {offsets = [0, 0], sizes = [8, 40], strides = [1, 1]} : vector<16x40xf32> to vector<8x40xf32>
    %6 = vector.extract_strided_slice %4 {offsets = [8, 0], sizes = [8, 40], strides = [1, 1]} : vector<16x40xf32> to vector<8x40xf32>
    %7 = arith.mulf %5, %5 : vector<8x40xf32>
    %8 = arith.subf %6, %7 : vector<8x40xf32>
    %cst_3 = arith.constant 0.000000e+00 : f32
    %9 = vector.broadcast %cst_3 : f32 to vector<8x40xf32>
    %10 = arith.maximumf %8, %9 : vector<8x40xf32>
    %11 = arith.subf %0, %5 : vector<8x40xf32>
    %cst_4 = arith.constant 9.99999974E-6 : f32
    %12 = vector.broadcast %cst_4 : f32 to vector<8x40xf32>
    %13 = arith.addf %10, %12 : vector<8x40xf32>
    %14 = math.rsqrt %13 : vector<8x40xf32>
    %15 = arith.mulf %11, %14 : vector<8x40xf32>
    %16 = arith.truncf %15 : vector<8x40xf32> to vector<8x40xbf16>
    %c0_5 = arith.constant 0 : index
    %c0_6 = arith.constant 0 : index
    %17 = vector.load %arg3[%c0_5, %c0_6] : memref<40x256xbf16, #tpu.memory_space<vmem>>, vector<40x256xbf16>
    %cst_7 = arith.constant dense<0.000000e+00> : vector<8x256xf32>
    %18 = tpu.matmul %16, %17, %cst_7 {dimension_numbers = #tpu.dot_dimension_numbers<[1], [0], [0], [1], [0, 0, 1, 1], [], []>} : vector<8x40xbf16>, vector<40x256xbf16>, vector<8x256xf32> -> vector<8x256xf32>
    %c0_8 = arith.constant 0 : index
    %c0_9 = arith.constant 0 : index
    %19 = vector.load %arg4[%c0_8, %c0_9] : memref<1x256xf32, #tpu.memory_space<vmem>>, vector<1x256xf32>
    %20 = vector.broadcast %19 : vector<1x256xf32> to vector<8x256xf32>
    %21 = arith.addf %18, %20 : vector<8x256xf32>
    %cst_10 = arith.constant 0.000000e+00 : f32
    %22 = vector.broadcast %cst_10 : f32 to vector<8x256xf32>
    %23 = arith.maximumf %21, %22 : vector<8x256xf32>
    %24 = arith.truncf %23 : vector<8x256xf32> to vector<8x256xbf16>
    %c0_11 = arith.constant 0 : index
    %c0_12 = arith.constant 0 : index
    %25 = vector.load %arg5[%c0_11, %c0_12] : memref<256x128xbf16, #tpu.memory_space<vmem>>, vector<256x128xbf16>
    %cst_13 = arith.constant dense<0.000000e+00> : vector<8x128xf32>
    %26 = tpu.matmul %24, %25, %cst_13 {dimension_numbers = #tpu.dot_dimension_numbers<[1], [0], [0], [1], [0, 0, 1, 1], [], []>} : vector<8x256xbf16>, vector<256x128xbf16>, vector<8x128xf32> -> vector<8x128xf32>
    %c0_14 = arith.constant 0 : index
    %c0_15 = arith.constant 0 : index
    %27 = vector.load %arg6[%c0_14, %c0_15] : memref<1x128xf32, #tpu.memory_space<vmem>>, vector<1x128xf32>
    %28 = vector.broadcast %27 : vector<1x128xf32> to vector<8x128xf32>
    %29 = arith.addf %26, %28 : vector<8x128xf32>
    %cst_16 = arith.constant 0.000000e+00 : f32
    %30 = vector.broadcast %cst_16 : f32 to vector<8x128xf32>
    %31 = arith.maximumf %29, %30 : vector<8x128xf32>
    %32 = arith.truncf %31 : vector<8x128xf32> to vector<8x128xbf16>
    %c0_17 = arith.constant 0 : index
    %c0_18 = arith.constant 0 : index
    %33 = vector.load %arg7[%c0_17, %c0_18] : memref<128x128xbf16, #tpu.memory_space<vmem>>, vector<128x128xbf16>
    %cst_19 = arith.constant dense<0.000000e+00> : vector<8x128xf32>
    %34 = tpu.matmul %32, %33, %cst_19 {dimension_numbers = #tpu.dot_dimension_numbers<[1], [0], [0], [1], [0, 0, 1, 1], [], []>} : vector<8x128xbf16>, vector<128x128xbf16>, vector<8x128xf32> -> vector<8x128xf32>
    %c0_20 = arith.constant 0 : index
    %c0_21 = arith.constant 0 : index
    %35 = vector.load %arg8[%c0_20, %c0_21] : memref<1x128xf32, #tpu.memory_space<vmem>>, vector<1x128xf32>
    %36 = vector.broadcast %35 : vector<1x128xf32> to vector<8x128xf32>
    %37 = arith.addf %34, %36 : vector<8x128xf32>
    %cst_22 = arith.constant 0.000000e+00 : f32
    %38 = vector.broadcast %cst_22 : f32 to vector<8x128xf32>
    %39 = arith.maximumf %37, %38 : vector<8x128xf32>
    %c0_23 = arith.constant 0 : index
    %c0_24 = arith.constant 0 : index
    %40 = vector.load %arg9[%c0_23, %c0_24] : memref<1x128xf32, #tpu.memory_space<vmem>>, vector<1x128xf32>
    %41 = vector.broadcast %40 : vector<1x128xf32> to vector<8x128xf32>
    %42 = arith.mulf %39, %41 : vector<8x128xf32>
    %cst_25 = arith.constant dense<0.000000e+00> : vector<8xf32>
    %43 = vector.multi_reduction <add>, %42, %cst_25 [1] : vector<8x128xf32> to vector<8xf32>
    %44 = vector.shape_cast %43 : vector<8xf32> to vector<8x1xf32>
    %c0_26 = arith.constant 0 : index
    %c0_27 = arith.constant 0 : index
    %45 = vector.load %arg10[%c0_26, %c0_27] : memref<1x1xf32, #tpu.memory_space<vmem>>, vector<1x1xf32>
    %46 = vector.broadcast %45 : vector<1x1xf32> to vector<8x1xf32>
    %47 = arith.addf %44, %46 : vector<8x1xf32>
    %c0_28 = arith.constant 0 : index
    %c0_29 = arith.constant 0 : index
    %48 = vector.load %arg11[%c0_28, %c0_29] : memref<8x1xf32, #tpu.memory_space<vmem>>, vector<8x1xf32>
    tpu.vector_store %arg11[%c0_28, %c0_29], %47 {strides = array<i32>} : memref<8x1xf32, #tpu.memory_space<vmem>>, vector<8x1xf32>,
    return
  }
  func.func @transform_0(%arg0: i32) -> (i32, i32) {
    %c0_i32 = arith.constant 0 : i32
    %c0_i32_0 = arith.constant 0 : i32
    return %arg0, %c0_i32 : i32, i32
  }
  func.func @transform_1(%arg0: i32) -> (i32, i32) {
    %c0_i32 = arith.constant 0 : i32
    %c0_i32_0 = arith.constant 0 : i32
    %c0_i32_1 = arith.constant 0 : i32
    return %c0_i32, %c0_i32_0 : i32, i32
  }
  func.func @transform_2(%arg0: i32) -> (i32, i32) {
    %c0_i32 = arith.constant 0 : i32
    %c0_i32_0 = arith.constant 0 : i32
    %c0_i32_1 = arith.constant 0 : i32
    return %c0_i32, %c0_i32_0 : i32, i32
  }
  func.func @transform_3(%arg0: i32) -> (i32, i32) {
    %c0_i32 = arith.constant 0 : i32
    %c0_i32_0 = arith.constant 0 : i32
    %c0_i32_1 = arith.constant 0 : i32
    return %c0_i32, %c0_i32_0 : i32, i32
  }
  func.func @transform_4(%arg0: i32) -> (i32, i32) {
    %c0_i32 = arith.constant 0 : i32
    %c0_i32_0 = arith.constant 0 : i32
    %c0_i32_1 = arith.constant 0 : i32
    return %c0_i32, %c0_i32_0 : i32, i32
  }
  func.func @transform_5(%arg0: i32) -> (i32, i32) {
    %c0_i32 = arith.constant 0 : i32
    %c0_i32_0 = arith.constant 0 : i32
    %c0_i32_1 = arith.constant 0 : i32
    return %c0_i32, %c0_i32_0 : i32, i32
  }
  func.func @transform_6(%arg0: i32) -> (i32, i32) {
    %c0_i32 = arith.constant 0 : i32
    %c0_i32_0 = arith.constant 0 : i32
    %c0_i32_1 = arith.constant 0 : i32
    return %c0_i32, %c0_i32_0 : i32, i32
  }
  func.func @transform_7(%arg0: i32) -> (i32, i32) {
    %c0_i32 = arith.constant 0 : i32
    %c0_i32_0 = arith.constant 0 : i32
    %c0_i32_1 = arith.constant 0 : i32
    return %c0_i32, %c0_i32_0 : i32, i32
  }
  func.func @transform_8(%arg0: i32) -> (i32, i32) {
    %c0_i32 = arith.constant 0 : i32
    %c0_i32_0 = arith.constant 0 : i32
    %c0_i32_1 = arith.constant 0 : i32
    return %c0_i32, %c0_i32_0 : i32, i32
  }
  func.func @transform_9(%arg0: i32) -> (i32, i32) {
    %c0_i32 = arith.constant 0 : i32
    %c0_i32_0 = arith.constant 0 : i32
    %c0_i32_1 = arith.constant 0 : i32
    return %c0_i32, %c0_i32_0 : i32, i32
  }
  func.func @transform_10(%arg0: i32) -> (i32, i32) {
    %c0_i32 = arith.constant 0 : i32
    %c0_i32_0 = arith.constant 0 : i32
    return %arg0, %c0_i32 : i32, i32
  }
}

</mosaic_0001>

<bundles_post_ra>
// kernel: tpu_custom_call.1
= control target key start
LH: loop header
LB: loop body
LE: loop exit
PB: predicated region body
PF: predicated region fallthrough
CT: control target
= control target key end

     0   :  { %s1066_s0 = inlined_call_operand.hbm [shape: f32[8,40], index: 0, kind: input, shape index: {}]   ;;  %s1067_s1 = inlined_call_operand.hbm [shape: f32[40,40], index: 1, kind: input, shape index: {}]   ;;  %s1068_s2 = inlined_call_operand.hbm [shape: bf16[40,256], index: 2, kind: input, shape index: {}]   ;;  %s1069_s3 = inlined_call_operand.vmem [shape: f32[1,256], index: 3, kind: input, shape index: {}]   ;;  %s1070_s4 = inlined_call_operand.hbm [shape: bf16[256,128], index: 4, kind: input, shape index: {}]   ;;  %s1071_s5 = inlined_call_operand.vmem [shape: f32[1,128], index: 5, kind: input, shape index: {}]   ;;  %s1072_s6 = inlined_call_operand.hbm [shape: bf16[128,128], index: 6, kind: input, shape index: {}]   ;;  %s1073_s7 = inlined_call_operand.vmem [shape: f32[1,128], index: 7, kind: input, shape index: {}]   ;;  %s1074_s8 = inlined_call_operand.vmem [shape: f32[1,128], index: 8, kind: input, shape index: {}]   ;;  %s1075_s9 = inlined_call_operand.<no memory space> [shape: f32[1,1], index: 9, kind: input, shape index: {}]   ;;  %s1076_s10 = inlined_call_operand.vmem [shape: f32[8,1], index: 10, kind: output, shape index: {}]  }
   0x1   :  { %v15_v0 = vstv %s1075_s9 }
   0x2   :  { %16 = vst [vmem:[#allocation2] sm:$0x1] %v15_v0 }
   0x3   :  { %17 = vsyncpa [#allocation4], 0 }
   0x4   :  { %18 = vsyncpa [#allocation6], 0 }
   0x5   :  { %19 = vsyncpa [#allocation9], 0  ;;  %s893_s15 = smov [#allocation5]   ;;  %s777_s19 = scalar_lea.hbm %s1067_s1, 640 }
   0x6   :  { %s35_s16 = sshll.u32 %s893_s15, 4  ;;  %p778_p0 = scmp.ne.s32.totalorder %s1067_s1, %s777_s19  ;;  %s36_s16 = int_to_ptr.vmem [resolvable:$true] %s35_s16 }
   0x7   :  { %p781_p1 = scmp.lt.u32.totalorder %s777_s19, %s1067_s1 }
   0x9   :  { %p783_p2 = pnand %p781_p1, %p778_p0 }
   0xb   :  { %786 = shalt.err (!%p783_p2)
}
   0xc   :  { %s787_s9 = scalar_lea.vmem %s36_s16, 640  ;;  %p792_p4 = scmp.lt.s32.totalorder %s36_s16, %s36_s16 }
   0xd   :  { %p788_p3 = scmp.ne.s32.totalorder %s36_s16, %s787_s9  ;;  %p793_p5 = scmp.lt.s32.totalorder %s787_s9, %s787_s9 }
   0xf   :  { %p794_p6 = por %p793_p5, %p792_p4 }
  0x11   :  { %p795_p7 = pnand %p794_p6, %p788_p3 }
  0x13   :  { %798 = shalt.err (!%p795_p7)
}
  0x14   :  { %s894_s24 = smov 128   ;;  %s895_s25 = smov 8  }
  0x15   :  { %41 = dma.hbm_to_vmem [thread:$0]  %s1067_s1, 640, %s36_s16, [#allocation6], %s894_s24, %s894_s24, %s895_s25  }
  0x16   :  { %s896_s28 = smov [#allocation8]   ;;  %s799_s12 = scalar_lea.hbm %s1070_s4, 2048 }
  0x17   :  { %s61_s29 = sshll.u32 %s896_s28, 4  ;;  %p800_p8 = scmp.ne.s32.totalorder %s1070_s4, %s799_s12  ;;  %s62_s29 = int_to_ptr.vmem [resolvable:$true] %s61_s29 }
  0x18   :  { %p803_p9 = scmp.lt.u32.totalorder %s799_s12, %s1070_s4 }
  0x1a   :  { %p805_p10 = pnand %p803_p9, %p800_p8 }
  0x1c   :  { %808 = shalt.err (!%p805_p10)
}
  0x1d   :  { %s809_s18 = scalar_lea.vmem %s62_s29, 2048  ;;  %p814_p12 = scmp.lt.s32.totalorder %s62_s29, %s62_s29 }
  0x1e   :  { %p810_p11 = scmp.ne.s32.totalorder %s62_s29, %s809_s18  ;;  %p815_p13 = scmp.lt.s32.totalorder %s809_s18, %s809_s18 }
  0x20   :  { %p816_p0 = por %p815_p13, %p814_p12 }
  0x22   :  { %p817_p1 = pnand %p816_p0, %p810_p11 }
  0x24   :  { %820 = shalt.err (!%p817_p1)
}
  0x25   :  { %s897_s1 = smov 64   ;;  %s898_s16 = smov 4  }
  0x26   :  { %67 = dma.hbm_to_vmem [thread:$0]  %s1070_s4, 2048, %s62_s29, [#allocation9], %s897_s1, %s897_s1, %s898_s16  }
  0x27   :  { %s899_s21 = smov [#allocation3]   ;;  %s900_s23 = smov [#allocation7]  }
  0x28   :  { %s26_s22 = sshll.u32 %s899_s21, 4  ;;  %s47_s9 = sshll.u32 %s900_s23, 4  ;;  %s27_s22 = int_to_ptr.vmem [resolvable:$true] %s26_s22  ;;  %s993_s9 = int_to_ptr.vmem [resolvable:$true] %s47_s9 }
  0x29   :  { %s821_s28 = scalar_lea.hbm %s1066_s0, 128 }
  0x2a   :  { %p822_p2 = scmp.ne.s32.totalorder %s1066_s0, %s821_s28  ;;  %p825_p3 = scmp.lt.u32.totalorder %s821_s28, %s1066_s0 }
  0x2c   :  { %p827_p4 = pnand %p825_p3, %p822_p2 }
  0x2e   :  { %830 = shalt.err (!%p827_p4)
}
  0x2f   :  { %s831_s4 = scalar_lea.vmem %s27_s22, 128  ;;  %p836_p6 = scmp.lt.s32.totalorder %s27_s22, %s27_s22 }
  0x30   :  { %p832_p5 = scmp.ne.s32.totalorder %s27_s22, %s831_s4  ;;  %p837_p7 = scmp.lt.s32.totalorder %s831_s4, %s831_s4 }
  0x32   :  { %p838_p8 = por %p837_p7, %p836_p6 }
  0x34   :  { %p839_p9 = pnand %p838_p8, %p832_p5 }
  0x36   :  { %842 = shalt.err (!%p839_p9)
}
  0x37   :  { %29 = dma.hbm_to_vmem [thread:$0]  %s1066_s0, 128, %s27_s22, [#allocation4]  }
  0x38   :  { %s843_s18 = scalar_lea.hbm %s1068_s2, 640 }
  0x39   :  { %p844_p10 = scmp.ne.s32.totalorder %s1068_s2, %s843_s18  ;;  %p847_p11 = scmp.lt.u32.totalorder %s843_s18, %s1068_s2 }
  0x3b   :  { %p849_p12 = pnand %p847_p11, %p844_p10 }
  0x3d   :  { %852 = shalt.err (!%p849_p12)
}
  0x3e   :  { %s853_s26 = scalar_lea.vmem %s993_s9, 640  ;;  %p858_p0 = scmp.lt.s32.totalorder %s993_s9, %s993_s9 }
  0x3f   :  { %p854_p13 = scmp.ne.s32.totalorder %s993_s9, %s853_s26  ;;  %p859_p1 = scmp.lt.s32.totalorder %s853_s26, %s853_s26 }
  0x41   :  { %p860_p2 = por %p859_p1, %p858_p0 }
  0x43   :  { %p861_p3 = pnand %p860_p2, %p854_p13 }
  0x45   :  { %864 = shalt.err (!%p861_p3)
}
  0x46   :  { %53 = dma.hbm_to_vmem [thread:$0]  %s1068_s2, 640, %s993_s9, [#allocation6], %s894_s24, %s894_s24, %s895_s25  }
  0x47   :  { %s901_s27 = smov [#allocation10]   ;;  %s865_s12 = scalar_lea.hbm %s1072_s6, 1024 }
  0x48   :  { %s75_s28 = sshll.u32 %s901_s27, 4  ;;  %p866_p4 = scmp.ne.s32.totalorder %s1072_s6, %s865_s12  ;;  %s76_s28 = int_to_ptr.vmem [resolvable:$true] %s75_s28 }
  0x49   :  { %p869_p5 = scmp.lt.u32.totalorder %s865_s12, %s1072_s6 }
  0x4b   :  { %p871_p6 = pnand %p869_p5, %p866_p4 }
  0x4d   :  { %874 = shalt.err (!%p871_p6)
}
  0x4e   :  { %s875_s15 = scalar_lea.vmem %s76_s28, 1024  ;;  %p880_p8 = scmp.lt.s32.totalorder %s76_s28, %s76_s28 }
  0x4f   :  { %p876_p7 = scmp.ne.s32.totalorder %s76_s28, %s875_s15  ;;  %p881_p9 = scmp.lt.s32.totalorder %s875_s15, %s875_s15 }
  0x51   :  { %p882_p10 = por %p881_p9, %p880_p8 }
  0x53   :  { %p883_p11 = pnand %p882_p10, %p876_p7 }
  0x55   :  { %886 = shalt.err (!%p883_p11)
}
  0x56   :  { %81 = dma.hbm_to_vmem [thread:$0]  %s1072_s6, 1024, %s76_s28, [#allocation9], %s897_s1, %s897_s1, %s898_s16  }
  0x57   :  { %887 = dma.done.wait [#allocation4], 128  }
  0x58   :  { %888 = vsyncadd [#allocation4], 4294967168 }
  0x59   :  { %889 = dma.done.wait [#allocation6], 1280  }
  0x5a   :  { %890 = vsyncadd [#allocation6], 4294966016 }
  0x5b   :  { %891 = dma.done.wait [#allocation9], 3072  }
  0x5c   :  { %892 = vsyncadd [#allocation9], 4294964224  ;;  %vm111_vm0 = vcmask 326656   ;;  %v106_v1 = vld [vmem:[#allocation5] sm:$0xff]  ;;  %v107_v2 = vld [vmem:[#allocation5 + $0x8] sm:$0xff]  ;;  %vm246_vm1 = vcmask 1043456   ;;  %v208_v52 = vlaneseq }
  0x5d   :  { %v108_v3 = vld [vmem:[#allocation5 + $0x10] sm:$0xff]  ;;  %v723_v4 = vpack.c.bf16 %v107_v2, %v106_v1  ;;  %v109_v5 = vld [vmem:[#allocation5 + $0x18] sm:$0xff]  ;;  %v110_v8 = vld [vmem:[#allocation5 + $0x20] sm:$0xff]  ;;  %v902_v18 = vmov 0   ;;  %v903_v46 = vmov 0.0   ;;  %vm904_vm2 = vmmov 0  }
  0x5e   :  { %v1042_v6 = vld [vmem:[#allocation3] sm:$0xff]  ;;  %v727_v7 = vpack.c.bf16 %v109_v5, %v108_v3  ;;  %v743_v10 = vld [vmem:[#allocation7 + $0x4] ss:$8 sps:$4 sm:$0xff]   ;;  %v745_v11 = vld [vmem:[#allocation7] ss:$8 sps:$4 sm:$0xff]   ;;  %285 = vmatprep.mubr.bf16.mxu1 %v902_v18  ;;  %v209_v53 = vshrl.u32 %v208_v52, 7 }
  0x5f   :  { %700 = vmatprep.mubr.msk.f32.mxu0 %vm111_vm0, %v1042_v6  ;;  %724 = vmatprep.subr.bf16.mxu0 %v723_v4  ;;  %v105_v9 = vmul.f32 %v1042_v6, %v1042_v6  ;;  %v746_v12 = vld [vmem:[#allocation7 + $0x14] ss:$8 sps:$4 sm:$0xff]   ;;  %v748_v13 = vld [vmem:[#allocation7 + $0x10] ss:$8 sps:$4 sm:$0xff]   ;;  %v205_v14 = vld [vmem:[#allocation7 + $0x20] sm:$0xff]  ;;  %vm605_vm3 = vcmask 7168  }
  0x60   :  { %726 = vmatpush3.bf16.msra.mxu0 %v723_v4  ;;  %253 = vmatprep.subr.bf16.mxu1 %v743_v10  ;;  %v621_v15 = vcombine.high %v205_v14, %v205_v14  ;;  %v620_v16 = vcombine.low %v205_v14, %v205_v14  ;;  %v751_v19 = vld [vmem:[#allocation8 + $0x40] sm:$0xff]   ;;  %v753_v21 = vld [vmem:[#allocation8 + $0x48] sm:$0xff]   ;;  %v755_v23 = vld [vmem:[#allocation8 + $0x50] sm:$0xff]   ;;  %v210_v54 = vsub.s32 0, %v209_v53  ;;  %v214_v56 = vsub.s32 1, %v209_v53 }
  0x61   :  { %728 = vmatprep.subr.bf16.mxu0 %v727_v7  ;;  %254 = vmatpush1.bf16.msra.mxu1 %v745_v11  ;;  %v752_v20 = vld [vmem:[#allocation8] sm:$0xff]   ;;  %v754_v22 = vld [vmem:[#allocation8 + $0x8] sm:$0xff]   ;;  %v756_v24 = vld [vmem:[#allocation8 + $0x10] sm:$0xff]  }
  0x62   :  { %255 = vmatprep.subr.bf16.mxu1 %v746_v12  ;;  %v248_v17 = vsel %vm246_vm1, %v620_v16, 0  ;;  %v757_v25 = vld [vmem:[#allocation8 + $0x58] sm:$0xff]   ;;  %v759_v27 = vld [vmem:[#allocation8 + $0x60] sm:$0xff]   ;;  %v761_v29 = vld [vmem:[#allocation8 + $0x68] sm:$0xff]  }
  0x63   :  { %v758_v26 = vld [vmem:[#allocation8 + $0x18] sm:$0xff]   ;;  %v760_v28 = vld [vmem:[#allocation8 + $0x20] sm:$0xff]   ;;  %v762_v30 = vld [vmem:[#allocation8 + $0x28] sm:$0xff]  }
  0x64   :  { %730 = vmatpush3.bf16.msra.mxu0 %v727_v7  ;;  %v763_v41 = vld [vmem:[#allocation8 + $0x70] sm:$0xff]   ;;  %v765_v43 = vld [vmem:[#allocation8 + $0x78] sm:$0xff]   ;;  %v767_v45 = vld [vmem:[#allocation10] sm:$0xff]  }
  0x65   :  { %698 = vmatprep.subr.mxu0 %v110_v8  ;;  %256 = vmatpush1.bf16.msra.mxu1 %v748_v13  ;;  %v764_v42 = vld [vmem:[#allocation8 + $0x30] sm:$0xff]   ;;  %v766_v44 = vld [vmem:[#allocation8 + $0x38] sm:$0xff]   ;;  %v768_v47 = vld [vmem:[#allocation10 + $0x8] sm:$0xff]  }
  0x66   :  { %622 = vmatprep.subr.msk.bf16.mxu1 %vm246_vm1, %v621_v15  ;;  %v769_v48 = vld [vmem:[#allocation10 + $0x10] sm:$0xff]   ;;  %v770_v49 = vld [vmem:[#allocation10 + $0x18] sm:$0xff]   ;;  %v771_v50 = vld [vmem:[#allocation10 + $0x20] sm:$0xff]  }
  0x67   :  { %v772_v51 = vld [vmem:[#allocation10 + $0x28] sm:$0xff]   ;;  %v773_v5 = vld [vmem:[#allocation10 + $0x30] sm:$0xff]   ;;  %v641_v16 = vld [vmem:[%s1073_s7] ss:$0 sm:$0xff] }
  0x68   :  { %699 = vmatpush3.msra.mxu0 %v110_v8  ;;  %v206_v55 = vld [vmem:[%s1069_s3] sm:$0x3] }
  0x69   :  { %701 = vmatmul.mubr.msk.f32.vlgmr.msra.gmra.mrb[0].mxu0 %vm111_vm0, %v105_v9  ;;  %258 = vmatpush1.bf16.msra.mxu1 %v248_v17  ;;  %v211_v57 = vrot.slane %v206_v55, %v210_v54  ;;  %v215_v58 = vrot.slane %v206_v55, %v214_v56  ;;  %v624_v8 = vld [vmem:[%s1071_s5] ss:$0 sm:$0xff] }
  0x6a   :  { %659 = vmatprep.subr.bf16.mxu0 %v751_v19  ;;  %703 = vmatprep.subr.bf16.mxu1 %v903_v46 }
  0x6b   :  { %660 = vmatpush3.bf16.msra.mxu0 %v752_v20 }
  0x6c   :  { %661 = vmatprep.subr.bf16.mxu0 %v753_v21  ;;  %v650_v21 = vld [vmem:[%s1074_s8] ss:$0 sm:$0xff] }
  0x6f   :  { %662 = vmatpush3.bf16.msra.mxu0 %v754_v22 }
  0x70   :  { %663 = vmatprep.subr.bf16.mxu0 %v755_v23 }
  0x73   :  { %664 = vmatpush3.bf16.msra.mxu0 %v756_v24 }
  0x74   :  { %665 = vmatprep.subr.bf16.mxu0 %v757_v25  ;;  %v651_v25 = vld [vmem:[#allocation2] ss:$0 sm:$0xff] }
  0x77   :  { %666 = vmatpush3.bf16.msra.mxu0 %v758_v26 }
  0x78   :  { %667 = vmatprep.subr.bf16.mxu0 %v759_v27 }
  0x7b   :  { %668 = vmatpush3.bf16.msra.mxu0 %v760_v28 }
  0x7c   :  { %669 = vmatprep.subr.bf16.mxu0 %v761_v29 }
  0x7f   :  { %670 = vmatpush3.bf16.msra.mxu0 %v762_v30 }
  0x80   :  { %671 = vmatprep.subr.bf16.mxu0 %v763_v41 }
  0x83   :  { %672 = vmatpush3.bf16.msra.mxu0 %v764_v42 }
  0x84   :  { %673 = vmatprep.subr.bf16.mxu0 %v765_v43 }
  0x87   :  { %674 = vmatpush3.bf16.msra.mxu0 %v766_v44 }
 0x13c   :  { %v702_v31 = vpop.f32.mrb[0].mxu0 }
 0x13d   :  { %v184_v32 = vpop.f32.mrb[1].mxu0 }
 0x13e   :  { %v193_v33 = vmul.f32 %v184_v32, %v184_v32  ;;  %v196_v37 = vsub.f32 %v1042_v6, %v184_v32  ;;  %v774_v6 = vld [vmem:[#allocation10 + $0x38] sm:$0xff]  }
 0x140   :  { %v194_v34 = vsub.f32 %v702_v31, %v193_v33 }
 0x142   :  { %v195_v35 = vmax.f32 %v194_v34, 0.0 }
 0x144   :  { %v197_v36 = vadd.f32 1e-05, %v195_v35 }
 0x146   :  { %775 = vrsqrt.f32 %v197_v36 }
 0x150   :  { %v776_v38 = vpop.eup %775 }
 0x151   :  { %v199_v39 = vmul.f32 %v776_v38, %v196_v37 }
 0x153   :  { %v200_v40 = vpack.c.bf16 %v199_v39, %v199_v39 }
 0x155   :  { %623 = vmatmul.mubr.msk.bf16.vlgmr.msra.gmra.mrb[0].mxu1 %vm111_vm0, %v200_v40 }
 0x156   :  { %704 = vmatpush3.bf16.msra.mxu1 %v767_v45  ;;  %719 = vmatprep.mubr.msk.bf16.mxu1 %vm904_vm2, %v903_v46 }
 0x157   :  { %705 = vmatprep.subr.bf16.mxu1 %v903_v46 }
 0x15a   :  { %706 = vmatpush3.bf16.msra.mxu1 %v768_v47 }
 0x15b   :  { %707 = vmatprep.subr.bf16.mxu1 %v903_v46 }
 0x15e   :  { %708 = vmatpush3.bf16.msra.mxu1 %v769_v48 }
 0x15f   :  { %709 = vmatprep.subr.bf16.mxu1 %v903_v46 }
 0x162   :  { %710 = vmatpush3.bf16.msra.mxu1 %v770_v49 }
 0x163   :  { %711 = vmatprep.subr.bf16.mxu1 %v903_v46 }
 0x166   :  { %712 = vmatpush3.bf16.msra.mxu1 %v771_v50 }
 0x167   :  { %713 = vmatprep.subr.bf16.mxu1 %v903_v46 }
 0x16a   :  { %714 = vmatpush3.bf16.msra.mxu1 %v772_v51 }
 0x16b   :  { %715 = vmatprep.subr.bf16.mxu1 %v903_v46 }
 0x16e   :  { %716 = vmatpush3.bf16.msra.mxu1 %v773_v5 }
 0x16f   :  { %717 = vmatprep.subr.bf16.mxu1 %v903_v46 }
 0x172   :  { %718 = vmatpush3.bf16.msra.mxu1 %v774_v6 }
 0x228   :  { %v287_v59 = vpop.f32.mrb[0].mxu1 }
 0x229   :  { %v288_v60 = vadd.f32 %v287_v59, %v211_v57  ;;  %v289_v61 = vpop.f32.mrb[1].mxu1 }
 0x22a   :  { %v290_v62 = vadd.f32 %v289_v61, %v215_v58  ;;  %v291_v63 = vpop.f32.mrb[2].mxu1 }
 0x22b   :  { %v294_v0 = vmax.f32 %v288_v60, 0.0  ;;  %v292_v1 = vpop.f32.mrb[3].mxu1 }
 0x22c   :  { %v295_v2 = vmax.f32 %v290_v62, 0.0 }
 0x22d   :  { %v296_v4 = vpack.c.bf16 %v294_v0, %v294_v0 }
 0x22e   :  { %v297_v3 = vpack.c.bf16 %v295_v2, %v295_v2 }
 0x230   :  { %465 = vmatprep.mubr.bf16.mxu0 %v297_v3 }
 0x231   :  { %466 = vmatmul.mubr.bf16.vlgmr.msra.gmra.mrb[4].mxu0 %v296_v4 }
 0x304   :  { %v675_v7 = vpop.f32.mrb[4].mxu0 }
 0x305   :  { %v676_v9 = vpop.f32.mrb[5].mxu0 }
 0x306   :  { %v677_v10 = vadd.f32 %v676_v9, %v675_v7  ;;  %v678_v11 = vpop.f32.mrb[6].mxu0 }
 0x307   :  { %v679_v12 = vpop.f32.mrb[7].mxu0 }
 0x308   :  { %v468_v13 = vadd.f32 %v677_v10, %v624_v8 }
 0x30a   :  { %v473_v14 = vmax.f32 %v468_v13, 0.0 }
 0x30c   :  { %v474_v15 = vpack.c.bf16 %v473_v14, %v473_v14 }
 0x30e   :  { %720 = vmatmul.mubr.bf16.vlgmr.msra.gmra.mrb[4].mxu1 %v474_v15 }
 0x3e1   :  { %v580_v17 = vpop.f32.mrb[4].mxu1 }
 0x3e2   :  { %v581_v18 = vadd.f32 %v641_v16, %v580_v17  ;;  %v721_v19 = vpop.f32.mrb[5].mxu1 }
 0x3e3   :  { %v583_v20 = vpop.f32.mrb[6].mxu1 }
 0x3e4   :  { %v586_v22 = vmax.f32 %v581_v18, 0.0  ;;  %v722_v23 = vpop.f32.mrb[7].mxu1 }
 0x3e6   :  { %v594_v24 = vmul.f32 %v650_v21, %v586_v22 }
 0x3e8   :  { %595 = vadd.xlane.f32.xlu0 %v594_v24 }
 0x475   :  { %v596_v26 = vpop.xlane.xlu0 %595 }
 0x476   :  { %v604_v27 = vadd.f32 %v651_v25, %v596_v26 }
 0x478   :  { %606 = vst.msk [vmem:[%s1076_s10] sm:$0xff] %vm605_vm3, %v604_v27 }
 0x479   :  { %611 = vsyncpa [#allocation4], 1 }
 0x47a   :  { %612 = vsyncpa [#allocation6], 1 }
 0x47b   :  { %613 = vsyncpa [#allocation9], 1 }

</bundles_post_ra>
